<compile_context>
chip_gen: v6e
topology: v6e:2x2x1
jax: 0.10.0
libtpu: 0.0.40
codegen_flags: <defaults>
</compile_context>

<pallas_src>
import jax
import jax.numpy as jnp
from jax.experimental import pallas as pl
from jax.experimental.pallas import tpu as pltpu


def _round_up(n: int, m: int) -> int:
    return ((n + m - 1) // m) * m


def _fused_mlp_kernel(x_ref, w_ref, b_ref, o_ref):
    """y = sigmoid(x @ W_total + b_total) for one batch tile.

    x_ref : [TB, In]  f32   (cast to bf16 on the VPU for the MXU fast path)
    w_ref : [In, Out] bf16  (resident; constant index_map across the grid)
    b_ref : [1,  Out] f32
    o_ref : [TB, Out] f32
    """
    x_bf16 = x_ref[...].astype(jnp.bfloat16)
    acc = jnp.dot(x_bf16, w_ref[...], preferred_element_type=jnp.float32)
    acc = acc + b_ref[...]                      # bias add in f32
    # sigmoid: exp on the EUP, reciprocal (approx) also on the EUP slot.
    o_ref[...] = pl.reciprocal(1.0 + jnp.exp(-acc), approx=True).astype(o_ref.dtype)


def mlp_forward_pallas(x, w_folded, b_folded, *, tile_batch=512):
    """Batch-tiled fused MLP forward.

    x        : [B, In]   f32
    w_folded : [In, Out] bf16   (pre-folded affine weight)
    b_folded : [1, Out]  f32    (pre-folded affine bias)
    Returns [B, Out] f32.
    """
    B, in_dim = x.shape
    out_dim = w_folded.shape[1]

    # Batch tile: multiple of 8 sublanes (f32 activations), capped at tile_batch.
    tb = min(int(tile_batch), _round_up(B, 8))
    tb = max(8, (tb // 8) * 8)
    b_pad = _round_up(B, tb)
    if b_pad != B:
        x = jnp.pad(x, ((0, b_pad - B), (0, 0)))
    grid = (b_pad // tb,)

    flops = 2 * b_pad * in_dim * out_dim
    bytes_accessed = (b_pad * in_dim * 4            # x (f32)
                      + in_dim * out_dim * 2        # W (bf16)
                      + out_dim * 4                 # b (f32)
                      + b_pad * out_dim * 4)        # y (f32)

    y = pl.pallas_call(
        _fused_mlp_kernel,
        out_shape=jax.ShapeDtypeStruct((b_pad, out_dim), jnp.float32),
        grid=grid,
        in_specs=[
            pl.BlockSpec((tb, in_dim), lambda i: (i, 0)),       # x: tiled over batch
            pl.BlockSpec((in_dim, out_dim), lambda i: (0, 0)),  # W: resident
            pl.BlockSpec((1, out_dim), lambda i: (0, 0)),       # b: resident
        ],
        out_specs=pl.BlockSpec((tb, out_dim), lambda i: (i, 0)),
        compiler_params=pltpu.CompilerParams(
            dimension_semantics=("parallel",),   # shard batch tiles across TCs (v7x)
        ),
        cost_estimate=pl.CostEstimate(
            flops=flops,
            transcendentals=b_pad * out_dim,
            bytes_accessed=bytes_accessed,
        ),
    )(x, w_folded, b_folded)

    if b_pad != B:
        y = y[:B]
    return y


class CommonMLPPallas:
    """Mirror of the PyTorch CommonMLP forward: fc_layers (no activation in
    between, exactly as in the reference forward), output layer, sigmoid.

    Since the layer chain is activation-free, the affine maps are folded once
    at construction into (W_total, b_total); the Pallas kernel runs a single
    bf16 matmul (f32 accumulate) + f32 bias + sigmoid, tiled over the batch.
    """

    def __init__(self, input_dim, output_dim, layers, key, *, tile_batch=512):
        assert input_dim == layers[0]
        self.input_dim = input_dim
        self.output_dim = output_dim
        self.tile_batch = tile_batch

        sizes = list(zip(layers[:-1], layers[1:])) + [(layers[-1], output_dim)]
        self.params = []  # per-layer f32 (W [in,out], b [out]) — used by reference()
        for in_size, out_size in sizes:
            key, kw, kb = jax.random.split(key, 3)
            bound = 1.0 / (in_size ** 0.5)  # PyTorch default Linear init range
            W = jax.random.uniform(kw, (in_size, out_size), jnp.float32, -bound, bound)
            b = jax.random.uniform(kb, (out_size,), jnp.float32, -bound, bound)
            self.params.append((W, b))

        # Fold the activation-free chain into one affine map (done in f32).
        W_tot, b_tot = self.params[0]
        for Wi, bi in self.params[1:]:
            b_tot = b_tot @ Wi + bi
            W_tot = W_tot @ Wi
        self.w_folded = W_tot.astype(jnp.bfloat16)           # bf16 MXU fast path
        self.b_folded = b_tot.reshape(1, -1).astype(jnp.float32)

    def __call__(self, x):
        return mlp_forward_pallas(x, self.w_folded, self.b_folded,
                                  tile_batch=self.tile_batch)

    def reference(self, x):
        # Pure-f32 per-layer reference, matching the PyTorch forward exactly.
        vec = x
        for (W, b) in self.params[:-1]:
            vec = vec @ W + b
        W, b = self.params[-1]
        return jax.nn.sigmoid(vec @ W + b)


if __name__ == "__main__":
    key = jax.random.PRNGKey(0)
    key, kx = jax.random.split(key)

    # Shapes consistent with the module; batch large enough that the 1-D grid
    # actually has >1 step (512-row tiles -> grid=(2,)).
    batch = 1024
    layers = [32, 64, 32]
    input_dim = layers[0]
    output_dim = 16

    x = jax.random.normal(kx, (batch, input_dim), jnp.float32)

    model = CommonMLPPallas(input_dim, output_dim, layers, key, tile_batch=512)

    out = model(x)
    out = jax.block_until_ready(out)

    ref = model.reference(x)
    assert out.shape == (batch, output_dim)
    # bf16 matmul inputs + approx reciprocal vs. a pure-f32 chained reference:
    # post-sigmoid error is ~1e-3; 1e-2 tolerance is comfortably safe.
    assert jnp.allclose(out, ref, atol=1e-2, rtol=0.0), (
        float(jnp.max(jnp.abs(out - ref))))

    print("KERNEL_OK")
</pallas_src>

<mosaic_0001>
module attributes {stable_mosaic.version = 11 : i64} {
  func.func @_fused_mlp_kernel(%arg0: i32, %arg1: memref<512x32xf32, #tpu.memory_space<vmem>>, %arg2: memref<32x16xbf16, #tpu.memory_space<vmem>>, %arg3: memref<1x16xf32, #tpu.memory_space<vmem>>, %arg4: memref<512x16xf32, #tpu.memory_space<vmem>>) attributes {dimension_semantics = [#tpu.dimension_semantics<parallel>], iteration_bounds = array<i64: 2>, scalar_prefetch = 0 : i64, scratch_operands = 0 : i64, tpu.core_type = #tpu.core_type<tc>, window_params = [{transform_indices = @transform_0, window_bounds = array<i64: 512, 32>}, {pipeline_mode = #tpu.pipeline_mode<synchronous>, transform_indices = @transform_1, window_bounds = array<i64: 32, 16>}, {pipeline_mode = #tpu.pipeline_mode<synchronous>, transform_indices = @transform_2, window_bounds = array<i64: 1, 16>}, {transform_indices = @transform_3, window_bounds = array<i64: 512, 16>}]} {
    %c0 = arith.constant 0 : index
    %c0_0 = arith.constant 0 : index
    %0 = vector.load %arg1[%c0, %c0_0] : memref<512x32xf32, #tpu.memory_space<vmem>>, vector<512x32xf32>
    %1 = arith.truncf %0 : vector<512x32xf32> to vector<512x32xbf16>
    %c0_1 = arith.constant 0 : index
    %c0_2 = arith.constant 0 : index
    %2 = vector.load %arg2[%c0_1, %c0_2] : memref<32x16xbf16, #tpu.memory_space<vmem>>, vector<32x16xbf16>
    %cst = arith.constant dense<0.000000e+00> : vector<512x16xf32>
    %3 = tpu.matmul %1, %2, %cst {dimension_numbers = #tpu.dot_dimension_numbers<[1], [0], [0], [1], [0, 0, 1, 1], [], []>} : vector<512x32xbf16>, vector<32x16xbf16>, vector<512x16xf32> -> vector<512x16xf32>
    %c0_3 = arith.constant 0 : index
    %c0_4 = arith.constant 0 : index
    %4 = vector.load %arg3[%c0_3, %c0_4] : memref<1x16xf32, #tpu.memory_space<vmem>>, vector<1x16xf32>
    %5 = vector.broadcast %4 : vector<1x16xf32> to vector<512x16xf32>
    %6 = arith.addf %3, %5 : vector<512x16xf32>
    %cst_5 = arith.constant 0.000000e+00 : f32
    %7 = vector.broadcast %cst_5 : f32 to vector<512x16xf32>
    %8 = arith.subf %7, %6 : vector<512x16xf32>
    %9 = math.exp %8 : vector<512x16xf32>
    %cst_6 = arith.constant 1.000000e+00 : f32
    %10 = vector.broadcast %cst_6 : f32 to vector<512x16xf32>
    %11 = arith.addf %10, %9 : vector<512x16xf32>
    %12 = tpu.reciprocal %11 {approx = true} : vector<512x16xf32> -> vector<512x16xf32>
    %c0_7 = arith.constant 0 : index
    %c0_8 = arith.constant 0 : index
    %13 = vector.load %arg4[%c0_7, %c0_8] : memref<512x16xf32, #tpu.memory_space<vmem>>, vector<512x16xf32>
    tpu.vector_store %arg4[%c0_7, %c0_8], %12 {strides = array<i32>} : memref<512x16xf32, #tpu.memory_space<vmem>>, vector<512x16xf32>,
    return
  }
  func.func @transform_0(%arg0: i32) -> (i32, i32) {
    %c0_i32 = arith.constant 0 : i32
    %c0_i32_0 = arith.constant 0 : i32
    return %arg0, %c0_i32 : i32, i32
  }
  func.func @transform_1(%arg0: i32) -> (i32, i32) {
    %c0_i32 = arith.constant 0 : i32
    %c0_i32_0 = arith.constant 0 : i32
    %c0_i32_1 = arith.constant 0 : i32
    return %c0_i32, %c0_i32_0 : i32, i32
  }
  func.func @transform_2(%arg0: i32) -> (i32, i32) {
    %c0_i32 = arith.constant 0 : i32
    %c0_i32_0 = arith.constant 0 : i32
    %c0_i32_1 = arith.constant 0 : i32
    return %c0_i32, %c0_i32_0 : i32, i32
  }
  func.func @transform_3(%arg0: i32) -> (i32, i32) {
    %c0_i32 = arith.constant 0 : i32
    %c0_i32_0 = arith.constant 0 : i32
    return %arg0, %c0_i32 : i32, i32
  }
}

</mosaic_0001>

<bundles_post_ra>
// kernel: tpu_custom_call.1
= control target key start
LH: loop header
LB: loop body
LE: loop exit
PB: predicated region body
PF: predicated region fallthrough
CT: control target
= control target key end

     0   :  { %s1568_s12 = smov 0   ;;  %s1896_s0 = inlined_call_operand.vmem [shape: f32[1024,32], index: 0, kind: input, shape index: {}]   ;;  %s1897_s1 = inlined_call_operand.vmem [shape: bf16[32,16], index: 1, kind: input, shape index: {}]   ;;  %s1898_s2 = inlined_call_operand.vmem [shape: f32[1,16], index: 2, kind: input, shape index: {}]   ;;  %s1899_s3 = inlined_call_operand.vmem [shape: f32[1024,16], index: 3, kind: output, shape index: {}]  }
   0x1 LB: > { %s1121_s13 = sadd.s32 4294967295, %s1546_s12   ;;  %p1125_p0 = scmp.ge.s32.totalorder %s1546_s12, 1  ;;  %s1546_s12 = sphi %s1568_s12, %s13_s12  }
   0x2   : > { %p138_p1 = scmp.lt.s32.totalorder %s1546_s12, 3 }
   0x4   : > { %p139_p2 = pnand %p1125_p0, %p138_p1 }
   0x5   : > { %s1126_s16 = sshll.u32 (!%p139_p2), %s1121_s13, 6 }
   0x6   : > { %142 = sbr.rel (%p139_p2) target bundleno = 361 (0x169), region = 32  ;;  %p163_p3 = scmp.lt.s32.totalorder (!%p139_p2), %s1126_s16, 127 }
   0xb   : > { %v1281_v0 = vld [vmem:[%s1897_s1 + $0x8] sm:$0xff]   ;;  %v1282_v1 = vld [vmem:[%s1897_s1] sm:$0xff]   ;;  %s1901_s16 = smov (!%p163_p3, %s1126_s16), 127  ;;  %vm294_vm0 = vcmask 261120   ;;  %vm1000_vm1 = vcmask 130048  }
   0xc   : > { %1201 = vmatprep.subr.bf16.mxu0 %v1281_v0  ;;  %1269 = vmatprep.subr.bf16.mxu1 %v1281_v0  ;;  %s1127_s19 = sshll.u32 %s1901_s16, 3 }
   0xd   : > { %1202 = vmatpush3.bf16.msra.mxu0 %v1281_v0  ;;  %1271 = vmatpush3.bf16.msra.mxu1 %v1281_v0  ;;  %s1590_s22 = scalar_lea.vmem %s1896_s0, %s1127_s19  ;;  %s1721_s27 = scalar_lea.vmem %s1899_s3, %s1127_s19 }
   0xe   : > { %1203 = vmatprep.subr.bf16.mxu0 %v1282_v1  ;;  %1270 = vmatprep.subr.bf16.mxu1 %v1282_v1  ;;  %v175_v2 = vld [vmem:[%s1590_s22] sm:$0xff]  ;;  %v176_v3 = vld [vmem:[%s1590_s22 + $0x8] sm:$0xff]  ;;  %v177_v7 = vld [vmem:[%s1590_s22 + $0x10] sm:$0xff] }
   0xf   : > { %v207_v4 = vld [vmem:[%s1590_s22 + $0x100] sm:$0xff]  ;;  %v239_v5 = vpack.c.bf16 %v176_v3, %v175_v2  ;;  %v208_v6 = vld [vmem:[%s1590_s22 + $0x108] sm:$0xff]  ;;  %v178_v8 = vld [vmem:[%s1590_s22 + $0x18] sm:$0xff] }
  0x10   : > { %v255_v9 = vpack.c.bf16 %v208_v6, %v207_v4  ;;  %v240_v10 = vpack.c.bf16 %v178_v8, %v177_v7  ;;  %v209_v11 = vld [vmem:[%s1590_s22 + $0x110] sm:$0xff]  ;;  %v210_v12 = vld [vmem:[%s1590_s22 + $0x118] sm:$0xff]  ;;  %v179_v13 = vld [vmem:[%s1590_s22 + $0x20] sm:$0xff] }
  0x11   : > { %1204 = vmatpush3.bf16.msra.mxu0 %v1282_v1  ;;  %1272 = vmatpush3.bf16.msra.mxu1 %v1282_v1  ;;  %v256_v14 = vpack.c.bf16 %v210_v12, %v209_v11  ;;  %v180_v15 = vld [vmem:[%s1590_s22 + $0x28] sm:$0xff]  ;;  %v211_v16 = vld [vmem:[%s1590_s22 + $0x120] sm:$0xff]  ;;  %v181_v20 = vld [vmem:[%s1590_s22 + $0x30] sm:$0xff] }
  0x12   : > { %1205 = vmatprep.mubr.msk.bf16.mxu0 %vm294_vm0, %v239_v5  ;;  %v212_v17 = vld [vmem:[%s1590_s22 + $0x128] sm:$0xff]  ;;  %1237 = vmatprep.mubr.msk.bf16.mxu1 %vm294_vm0, %v255_v9  ;;  %v241_v18 = vpack.c.bf16 %v180_v15, %v179_v13  ;;  %v182_v21 = vld [vmem:[%s1590_s22 + $0x38] sm:$0xff]  ;;  %v213_v22 = vld [vmem:[%s1590_s22 + $0x130] sm:$0xff] }
  0x13   : > { %v257_v19 = vpack.c.bf16 %v212_v17, %v211_v16  ;;  %v214_v23 = vld [vmem:[%s1590_s22 + $0x138] sm:$0xff]  ;;  %v183_v24 = vld [vmem:[%s1590_s22 + $0x40] sm:$0xff]  ;;  %v184_v25 = vld [vmem:[%s1590_s22 + $0x48] sm:$0xff]  ;;  %v242_v28 = vpack.c.bf16 %v182_v21, %v181_v20 }
  0x14   : > { %1206 = vmatmul.mubr.msk.bf16.vlgmr.msra.gmra.mxu0 %vm294_vm0, %v240_v10  ;;  %1238 = vmatmul.mubr.msk.bf16.vlgmr.msra.gmra.mxu1 %vm294_vm0, %v256_v14  ;;  %v215_v26 = vld [vmem:[%s1590_s22 + $0x140] sm:$0xff]  ;;  %v216_v27 = vld [vmem:[%s1590_s22 + $0x148] sm:$0xff]  ;;  %v258_v29 = vpack.c.bf16 %v214_v23, %v213_v22  ;;  %v243_v30 = vpack.c.bf16 %v184_v25, %v183_v24  ;;  %v185_v32 = vld [vmem:[%s1590_s22 + $0x50] sm:$0xff] }
  0x15   : > { %1209 = vmatprep.mubr.msk.bf16.mxu0 %vm294_vm0, %v241_v18  ;;  %1241 = vmatprep.mubr.msk.bf16.mxu1 %vm294_vm0, %v257_v19  ;;  %v259_v31 = vpack.c.bf16 %v216_v27, %v215_v26  ;;  %v186_v33 = vld [vmem:[%s1590_s22 + $0x58] sm:$0xff]  ;;  %v217_v34 = vld [vmem:[%s1590_s22 + $0x150] sm:$0xff]  ;;  %v187_v36 = vld [vmem:[%s1590_s22 + $0x60] sm:$0xff] }
  0x16   : > { %v218_v35 = vld [vmem:[%s1590_s22 + $0x158] sm:$0xff]  ;;  %v188_v37 = vld [vmem:[%s1590_s22 + $0x68] sm:$0xff]  ;;  %v219_v38 = vld [vmem:[%s1590_s22 + $0x160] sm:$0xff]  ;;  %v244_v40 = vpack.c.bf16 %v186_v33, %v185_v32 }
  0x17   : > { %v220_v39 = vld [vmem:[%s1590_s22 + $0x168] sm:$0xff]  ;;  %v260_v41 = vpack.c.bf16 %v218_v35, %v217_v34  ;;  %v245_v42 = vpack.c.bf16 %v188_v37, %v187_v36  ;;  %v189_v44 = vld [vmem:[%s1590_s22 + $0x70] sm:$0xff]  ;;  %v190_v45 = vld [vmem:[%s1590_s22 + $0x78] sm:$0xff] }
  0x18   : > { %v261_v43 = vpack.c.bf16 %v220_v39, %v219_v38  ;;  %v221_v46 = vld [vmem:[%s1590_s22 + $0x170] sm:$0xff]  ;;  %v222_v47 = vld [vmem:[%s1590_s22 + $0x178] sm:$0xff]  ;;  %v191_v48 = vld [vmem:[%s1590_s22 + $0x80] sm:$0xff]  ;;  %v246_v52 = vpack.c.bf16 %v190_v45, %v189_v44 }
  0x19   : > { %v192_v49 = vld [vmem:[%s1590_s22 + $0x88] sm:$0xff]  ;;  %v223_v50 = vld [vmem:[%s1590_s22 + $0x180] sm:$0xff]  ;;  %v262_v53 = vpack.c.bf16 %v222_v47, %v221_v46  ;;  %v193_v56 = vld [vmem:[%s1590_s22 + $0x90] sm:$0xff] }
  0x1a   : > { %v224_v51 = vld [vmem:[%s1590_s22 + $0x188] sm:$0xff]  ;;  %v247_v54 = vpack.c.bf16 %v192_v49, %v191_v48  ;;  %v194_v57 = vld [vmem:[%s1590_s22 + $0x98] sm:$0xff]  ;;  %v225_v58 = vld [vmem:[%s1590_s22 + $0x190] sm:$0xff] }
  0x1b   : > { %v263_v55 = vpack.c.bf16 %v224_v51, %v223_v50  ;;  %v226_v59 = vld [vmem:[%s1590_s22 + $0x198] sm:$0xff]  ;;  %v195_v60 = vld [vmem:[%s1590_s22 + $0xa0] sm:$0xff]  ;;  %v196_v61 = vld [vmem:[%s1590_s22 + $0xa8] sm:$0xff]  ;;  %v248_v0 = vpack.c.bf16 %v194_v57, %v193_v56 }
  0x1c   : > { %1210 = vmatmul.mubr.msk.bf16.gmra.mxu0 %vm294_vm0, %v242_v28  ;;  %1242 = vmatmul.mubr.msk.bf16.gmra.mxu1 %vm294_vm0, %v258_v29  ;;  %v227_v62 = vld [vmem:[%s1590_s22 + $0x1a0] sm:$0xff]  ;;  %v228_v63 = vld [vmem:[%s1590_s22 + $0x1a8] sm:$0xff]  ;;  %v264_v1 = vpack.c.bf16 %v226_v59, %v225_v58  ;;  %v249_v2 = vpack.c.bf16 %v196_v61, %v195_v60  ;;  %v197_v4 = vld [vmem:[%s1590_s22 + $0xb0] sm:$0xff] }
  0x1d   : > { %1213 = vmatprep.mubr.msk.bf16.mxu0 %vm294_vm0, %v243_v30  ;;  %1245 = vmatprep.mubr.msk.bf16.mxu1 %vm294_vm0, %v259_v31  ;;  %v265_v3 = vpack.c.bf16 %v228_v63, %v227_v62  ;;  %v198_v5 = vld [vmem:[%s1590_s22 + $0xb8] sm:$0xff]  ;;  %v229_v6 = vld [vmem:[%s1590_s22 + $0x1b0] sm:$0xff]  ;;  %v199_v8 = vld [vmem:[%s1590_s22 + $0xc0] sm:$0xff] }
  0x1e   : > { %v230_v7 = vld [vmem:[%s1590_s22 + $0x1b8] sm:$0xff]  ;;  %v200_v9 = vld [vmem:[%s1590_s22 + $0xc8] sm:$0xff]  ;;  %v231_v10 = vld [vmem:[%s1590_s22 + $0x1c0] sm:$0xff]  ;;  %v250_v12 = vpack.c.bf16 %v198_v5, %v197_v4 }
  0x1f   : > { %v232_v11 = vld [vmem:[%s1590_s22 + $0x1c8] sm:$0xff]  ;;  %v266_v13 = vpack.c.bf16 %v230_v7, %v229_v6  ;;  %v251_v14 = vpack.c.bf16 %v200_v9, %v199_v8  ;;  %v201_v16 = vld [vmem:[%s1590_s22 + $0xd0] sm:$0xff]  ;;  %v202_v17 = vld [vmem:[%s1590_s22 + $0xd8] sm:$0xff] }
  0x20   : > { %v267_v15 = vpack.c.bf16 %v232_v11, %v231_v10  ;;  %v233_v18 = vld [vmem:[%s1590_s22 + $0x1d0] sm:$0xff]  ;;  %v234_v19 = vld [vmem:[%s1590_s22 + $0x1d8] sm:$0xff]  ;;  %v203_v20 = vld [vmem:[%s1590_s22 + $0xe0] sm:$0xff]  ;;  %v252_v24 = vpack.c.bf16 %v202_v17, %v201_v16 }
  0x21   : > { %v204_v21 = vld [vmem:[%s1590_s22 + $0xe8] sm:$0xff]  ;;  %v235_v22 = vld [vmem:[%s1590_s22 + $0x1e0] sm:$0xff]  ;;  %v268_v25 = vpack.c.bf16 %v234_v19, %v233_v18  ;;  %v205_v28 = vld [vmem:[%s1590_s22 + $0xf0] sm:$0xff] }
  0x22   : > { %v236_v23 = vld [vmem:[%s1590_s22 + $0x1e8] sm:$0xff]  ;;  %v253_v26 = vpack.c.bf16 %v204_v21, %v203_v20  ;;  %v206_v29 = vld [vmem:[%s1590_s22 + $0xf8] sm:$0xff]  ;;  %v237_v30 = vld [vmem:[%s1590_s22 + $0x1f0] sm:$0xff] }
  0x23   : > { %v269_v27 = vpack.c.bf16 %v236_v23, %v235_v22  ;;  %v238_v31 = vld [vmem:[%s1590_s22 + $0x1f8] sm:$0xff]  ;;  %v254_v32 = vpack.c.bf16 %v206_v29, %v205_v28  ;;  %v1691_v34 = vld [vmem:[%s1898_s2] ss:$0 sm:$0xff] }
  0x24   : > { %1214 = vmatmul.mubr.msk.bf16.gmra.mxu0 %vm294_vm0, %v244_v40  ;;  %1246 = vmatmul.mubr.msk.bf16.gmra.mxu1 %vm294_vm0, %v260_v41  ;;  %v270_v33 = vpack.c.bf16 %v238_v31, %v237_v30 }
  0x25   : > { %1217 = vmatprep.mubr.msk.bf16.mxu0 %vm294_vm0, %v245_v42  ;;  %1249 = vmatprep.mubr.msk.bf16.mxu1 %vm294_vm0, %v261_v43 }
  0x2c   : > { %1218 = vmatmul.mubr.msk.bf16.gmra.mxu0 %vm294_vm0, %v246_v52  ;;  %1250 = vmatmul.mubr.msk.bf16.gmra.mxu1 %vm294_vm0, %v262_v53 }
  0x2d   : > { %1221 = vmatprep.mubr.msk.bf16.mxu0 %vm294_vm0, %v247_v54  ;;  %1253 = vmatprep.mubr.msk.bf16.mxu1 %vm294_vm0, %v263_v55 }
  0x34   : > { %1222 = vmatmul.mubr.msk.bf16.gmra.mxu0 %vm294_vm0, %v248_v0  ;;  %1254 = vmatmul.mubr.msk.bf16.gmra.mxu1 %vm294_vm0, %v264_v1 }
  0x35   : > { %1225 = vmatprep.mubr.msk.bf16.mxu0 %vm294_vm0, %v249_v2  ;;  %1257 = vmatprep.mubr.msk.bf16.mxu1 %vm294_vm0, %v265_v3 }
  0x3c   : > { %1226 = vmatmul.mubr.msk.bf16.gmra.mxu0 %vm294_vm0, %v250_v12  ;;  %1258 = vmatmul.mubr.msk.bf16.gmra.mxu1 %vm294_vm0, %v266_v13 }
  0x3d   : > { %1229 = vmatprep.mubr.msk.bf16.mxu0 %vm294_vm0, %v251_v14  ;;  %1261 = vmatprep.mubr.msk.bf16.mxu1 %vm294_vm0, %v267_v15 }
  0x44   : > { %1230 = vmatmul.mubr.msk.bf16.gmra.mxu0 %vm294_vm0, %v252_v24  ;;  %1262 = vmatmul.mubr.msk.bf16.gmra.mxu1 %vm294_vm0, %v268_v25 }
  0x45   : > { %1233 = vmatprep.mubr.msk.bf16.mxu0 %vm294_vm0, %v253_v26  ;;  %1265 = vmatprep.mubr.msk.bf16.mxu1 %vm294_vm0, %v269_v27 }
  0x4c   : > { %1234 = vmatmul.mubr.msk.bf16.gmra.mxu0 %vm294_vm0, %v254_v32  ;;  %1266 = vmatmul.mubr.msk.bf16.gmra.mxu1 %vm294_vm0, %v270_v33 }
  0xd4   : > { %v1207_v35 = vpop.f32.mrf.mxu0  ;;  %v1239_v37 = vpop.f32.mrf.mxu1 }
  0xd5   : > { %v434_v36 = vadd.f32 %v1207_v35, %v1691_v34  ;;  %v562_v38 = vadd.f32 %v1239_v37, %v1691_v34 }
  0xd6   : > { %v425_v39 = vpop.f32.mrf.mxu0  ;;  %v553_v42 = vpop.f32.mrf.mxu1 }
  0xd7   : > { %v682_v40 = vsub.f32 0.0, %v434_v36  ;;  %v426_v41 = vadd.f32 %v1691_v34, %v425_v39  ;;  %v714_v43 = vsub.f32 0.0, %v562_v38  ;;  %v554_v44 = vadd.f32 %v1691_v34, %v553_v42 }
  0xd8   : > { %v1208_v45 = vpop.f32.mrf.mxu0  ;;  %v1240_v49 = vpop.f32.mrf.mxu1 }
  0xd9   : > { %v748_v46 = vmul.f32 1.442695, %v682_v40  ;;  %v680_v47 = vsub.f32 0.0, %v426_v41  ;;  %v437_v48 = vadd.f32 %v1208_v45, %v1691_v34  ;;  %v812_v50 = vmul.f32 1.442695, %v714_v43 }
  0xda   : > { %v712_v51 = vsub.f32 0.0, %v554_v44  ;;  %v565_v52 = vadd.f32 %v1240_v49, %v1691_v34  ;;  %v428_v53 = vpop.f32.mrf.mxu0  ;;  %v556_v57 = vpop.f32.mrf.mxu1 }
  0xdb   : > { %1283 = vpow2.f32 %v748_v46  ;;  %v744_v54 = vmul.f32 1.442695, %v680_v47  ;;  %v683_v55 = vsub.f32 0.0, %v437_v48  ;;  %v429_v56 = vadd.f32 %v1691_v34, %v428_v53 }
  0xdc   : > { %1285 = vpow2.f32 %v812_v50  ;;  %v808_v58 = vmul.f32 1.442695, %v712_v51  ;;  %v715_v59 = vsub.f32 0.0, %v565_v52  ;;  %v557_v60 = vadd.f32 %v1691_v34, %v556_v57  ;;  %v1211_v61 = vpop.f32.mrf.mxu0  ;;  %v1243_v1 = vpop.f32.mrf.mxu1 }
  0xdd   : > { %1287 = vpow2.f32 %v744_v54  ;;  %v750_v62 = vmul.f32 1.442695, %v683_v55  ;;  %v681_v63 = vsub.f32 0.0, %v429_v56  ;;  %v450_v0 = vadd.f32 %v1211_v61, %v1691_v34 }
  0xde   : > { %1289 = vpow2.f32 %v808_v58  ;;  %v814_v2 = vmul.f32 1.442695, %v715_v59  ;;  %v713_v3 = vsub.f32 0.0, %v557_v60  ;;  %v578_v4 = vadd.f32 %v1243_v1, %v1691_v34  ;;  %v441_v5 = vpop.f32.mrf.mxu0  ;;  %v569_v9 = vpop.f32.mrf.mxu1 }
  0xdf   : > { %1291 = vpow2.f32 %v750_v62  ;;  %v746_v6 = vmul.f32 1.442695, %v681_v63  ;;  %v686_v7 = vsub.f32 0.0, %v450_v0  ;;  %v442_v8 = vadd.f32 %v1691_v34, %v441_v5 }
  0xe0   : > { %1293 = vpow2.f32 %v814_v2  ;;  %v810_v10 = vmul.f32 1.442695, %v713_v3  ;;  %v718_v11 = vsub.f32 0.0, %v578_v4  ;;  %v570_v12 = vadd.f32 %v1691_v34, %v569_v9  ;;  %v1212_v13 = vpop.f32.mrf.mxu0  ;;  %v1244_v17 = vpop.f32.mrf.mxu1 }
  0xe1   : > { %1295 = vpow2.f32 %v746_v6  ;;  %v756_v14 = vmul.f32 1.442695, %v686_v7  ;;  %v684_v15 = vsub.f32 0.0, %v442_v8  ;;  %v453_v16 = vadd.f32 %v1212_v13, %v1691_v34 }
  0xe2   : > { %1297 = vpow2.f32 %v810_v10  ;;  %v820_v18 = vmul.f32 1.442695, %v718_v11  ;;  %v716_v19 = vsub.f32 0.0, %v570_v12  ;;  %v581_v20 = vadd.f32 %v1244_v17, %v1691_v34  ;;  %v444_v21 = vpop.f32.mrf.mxu0  ;;  %v572_v25 = vpop.f32.mrf.mxu1 }
  0xe3   : > { %1299 = vpow2.f32 %v756_v14  ;;  %v752_v22 = vmul.f32 1.442695, %v684_v15  ;;  %v687_v23 = vsub.f32 0.0, %v453_v16  ;;  %v445_v24 = vadd.f32 %v1691_v34, %v444_v21 }
  0xe4   : > { %1301 = vpow2.f32 %v820_v18  ;;  %v816_v26 = vmul.f32 1.442695, %v716_v19  ;;  %v719_v27 = vsub.f32 0.0, %v581_v20  ;;  %v573_v28 = vadd.f32 %v1691_v34, %v572_v25  ;;  %v1215_v29 = vpop.f32.mrf.mxu0  ;;  %v1247_v32 = vpop.f32.mrf.mxu1 }
  0xe5   : > { %1303 = vpow2.f32 %v752_v22  ;;  %v758_v30 = vmul.f32 1.442695, %v687_v23  ;;  %v685_v31 = vsub.f32 0.0, %v445_v24  ;;  %v466_v50 = vadd.f32 %v1215_v29, %v1691_v34 }
  0xe6   : > { %1305 = vpow2.f32 %v816_v26  ;;  %v822_v33 = vmul.f32 1.442695, %v719_v27  ;;  %v717_v35 = vsub.f32 0.0, %v573_v28  ;;  %v457_v36 = vpop.f32.mrf.mxu0  ;;  %v585_v38 = vpop.f32.mrf.mxu1  ;;  %v594_v56 = vadd.f32 %v1247_v32, %v1691_v34 }
  0xe7   : > { %1307 = vpow2.f32 %v758_v30  ;;  %v754_v37 = vmul.f32 1.442695, %v685_v31  ;;  %v690_v62 = vsub.f32 0.0, %v466_v50  ;;  %v458_v2 = vadd.f32 %v1691_v34, %v457_v36 }
  0xe8   : > { %v1284_v39 = vpop.eup %1283  ;;  %1309 = vpow2.f32 %v822_v33  ;;  %v818_v40 = vmul.f32 1.442695, %v717_v35  ;;  %v1216_v41 = vpop.f32.mrf.mxu0  ;;  %v722_v5 = vsub.f32 0.0, %v594_v56  ;;  %v586_v8 = vadd.f32 %v1691_v34, %v585_v38 }
  0xe9   : > { %v1286_v42 = vpop.eup %1285  ;;  %v874_v43 = vadd.f32 1.0, %v1284_v39  ;;  %1311 = vpow2.f32 %v754_v37  ;;  %v1248_v44 = vpop.f32.mrf.mxu1  ;;  %v764_v12 = vmul.f32 1.442695, %v690_v62  ;;  %v469_v13 = vadd.f32 %v1216_v41, %v1691_v34 }
  0xea   : > { %v1288_v45 = vpop.eup %1287  ;;  %v906_v46 = vadd.f32 1.0, %v1286_v42  ;;  %1313 = vpow2.f32 %v818_v40  ;;  %v460_v47 = vpop.f32.mrf.mxu0  ;;  %v688_v17 = vsub.f32 0.0, %v458_v2  ;;  %v597_v18 = vadd.f32 %v1248_v44, %v1691_v34 }
  0xeb   : > { %v1290_v48 = vpop.eup %1289  ;;  %1315 = vrcp.f32 %v874_v43  ;;  %v872_v49 = vadd.f32 1.0, %v1288_v45  ;;  %v588_v51 = vpop.f32.mrf.mxu1  ;;  %v828_v21 = vmul.f32 1.442695, %v722_v5  ;;  %v461_v22 = vadd.f32 %v1691_v34, %v460_v47 }
  0xec   : > { %v1292_v52 = vpop.eup %1291  ;;  %1317 = vrcp.f32 %v906_v46  ;;  %v904_v53 = vadd.f32 1.0, %v1290_v48  ;;  %v1219_v59 = vpop.f32.mrf.mxu0  ;;  %v720_v25 = vsub.f32 0.0, %v586_v8  ;;  %v589_v26 = vadd.f32 %v1691_v34, %v588_v51 }
  0xed   : > { %v1294_v54 = vpop.eup %1293  ;;  %1319 = vrcp.f32 %v872_v49  ;;  %v875_v55 = vadd.f32 1.0, %v1292_v52  ;;  %v1251_v63 = vpop.f32.mrf.mxu1  ;;  %v691_v30 = vsub.f32 0.0, %v469_v13  ;;  %v482_v31 = vadd.f32 %v1219_v59, %v1691_v34 }
  0xee   : > { %v1296_v57 = vpop.eup %1295  ;;  %1321 = vrcp.f32 %v904_v53  ;;  %v907_v58 = vadd.f32 1.0, %v1294_v54  ;;  %v473_v9 = vpop.f32.mrf.mxu0  ;;  %v723_v36 = vsub.f32 0.0, %v597_v18  ;;  %v610_v37 = vadd.f32 %v1251_v63, %v1691_v34 }
  0xef   : > { %v1298_v60 = vpop.eup %1297  ;;  %1323 = vrcp.f32 %v875_v55  ;;  %v873_v61 = vadd.f32 1.0, %v1296_v57  ;;  %v601_v14 = vpop.f32.mrf.mxu1  ;;  %v760_v39 = vmul.f32 1.442695, %v688_v17  ;;  %v689_v40 = vsub.f32 0.0, %v461_v22 }
  0xf0   : > { %v1300_v0 = vpop.eup %1299  ;;  %1325 = vrcp.f32 %v907_v58  ;;  %v905_v1 = vadd.f32 1.0, %v1298_v60  ;;  %v1220_v27 = vpop.f32.mrf.mxu0  ;;  %v474_v41 = vadd.f32 %v1691_v34, %v473_v9  ;;  %v824_v43 = vmul.f32 1.442695, %v720_v25 }
  0xf1   : > { %v1302_v3 = vpop.eup %1301  ;;  %1327 = vrcp.f32 %v873_v61  ;;  %v878_v4 = vadd.f32 1.0, %v1300_v0  ;;  %v1252_v32 = vpop.f32.mrf.mxu1  ;;  %v721_v44 = vsub.f32 0.0, %v589_v26  ;;  %v602_v45 = vadd.f32 %v1691_v34, %v601_v14 }
  0xf2   : > { %v1304_v6 = vpop.eup %1303  ;;  %1329 = vrcp.f32 %v905_v1  ;;  %v910_v7 = vadd.f32 1.0, %v1302_v3  ;;  %v476_v46 = vpop.f32.mrf.mxu0  ;;  %v766_v48 = vmul.f32 1.442695, %v691_v30  ;;  %v694_v49 = vsub.f32 0.0, %v482_v31 }
  0xf3   : > { %v1306_v10 = vpop.eup %1305  ;;  %1331 = vrcp.f32 %v878_v4  ;;  %v876_v11 = vadd.f32 1.0, %v1304_v6  ;;  %v485_v50 = vadd.f32 %v1220_v27, %v1691_v34  ;;  %v604_v51 = vpop.f32.mrf.mxu1  ;;  %v830_v53 = vmul.f32 1.442695, %v723_v36 }
  0xf4   : > { %v1308_v15 = vpop.eup %1307  ;;  %1333 = vrcp.f32 %v910_v7  ;;  %v908_v16 = vadd.f32 1.0, %v1306_v10  ;;  %v726_v54 = vsub.f32 0.0, %v610_v37  ;;  %v613_v55 = vadd.f32 %v1252_v32, %v1691_v34  ;;  %v1223_v0 = vpop.f32.mrf.mxu0 }
  0xf5   : > { %v1310_v19 = vpop.eup %1309  ;;  %1335 = vrcp.f32 %v876_v11  ;;  %v879_v20 = vadd.f32 1.0, %v1308_v15  ;;  %v762_v57 = vmul.f32 1.442695, %v689_v40  ;;  %v692_v58 = vsub.f32 0.0, %v474_v41  ;;  %v1255_v4 = vpop.f32.mrf.mxu1 }
  0xf6   : > { %v1312_v23 = vpop.eup %1311  ;;  %1337 = vrcp.f32 %v908_v16  ;;  %v911_v24 = vadd.f32 1.0, %v1310_v19  ;;  %v477_v59 = vadd.f32 %v1691_v34, %v476_v46  ;;  %v826_v61 = vmul.f32 1.442695, %v721_v44  ;;  %v489_v14 = vpop.f32.mrf.mxu0 }
  0xf7   : > { %v1314_v28 = vpop.eup %1313  ;;  %1339 = vrcp.f32 %v879_v20  ;;  %v877_v29 = vadd.f32 1.0, %v1312_v23  ;;  %v724_v62 = vsub.f32 0.0, %v602_v45  ;;  %v605_v63 = vadd.f32 %v1691_v34, %v604_v51  ;;  %v617_v17 = vpop.f32.mrf.mxu1 }
  0xf8   : > { %v1316_v33 = vpop.eup %1315  ;;  %1341 = vrcp.f32 %v911_v24  ;;  %v909_v35 = vadd.f32 1.0, %v1314_v28  ;;  %v772_v2 = vmul.f32 1.442695, %v694_v49  ;;  %v695_v3 = vsub.f32 0.0, %v485_v50  ;;  %v1224_v24 = vpop.f32.mrf.mxu0 }
  0xf9   : > { %v1318_v38 = vpop.eup %1317  ;;  %1003 = vst.msk [vmem:[%s1721_s27 + $0x10] sm:$0xff] %vm1000_vm1, %v1316_v33  ;;  %1343 = vrcp.f32 %v877_v29  ;;  %v836_v6 = vmul.f32 1.442695, %v726_v54  ;;  %v727_v7 = vsub.f32 0.0, %v613_v55  ;;  %v768_v9 = vmul.f32 1.442695, %v692_v58  ;;  %v1256_v26 = vpop.f32.mrf.mxu1 }
  0xfa   : > { %v1320_v42 = vpop.eup %1319  ;;  %1035 = vst.msk [vmem:[%s1721_s27 + $0x110] sm:$0xff] %vm1000_vm1, %v1318_v38  ;;  %1345 = vrcp.f32 %v909_v35  ;;  %v693_v10 = vsub.f32 0.0, %v477_v59  ;;  %v725_v13 = vsub.f32 0.0, %v605_v63  ;;  %v774_v16 = vmul.f32 1.442695, %v695_v3  ;;  %v492_v32 = vpop.f32.mrf.mxu0 }
  0xfb   : > { %v1322_v47 = vpop.eup %1321  ;;  %1001 = vst.msk [vmem:[%s1721_s27] sm:$0xff] %vm1000_vm1, %v1320_v42  ;;  %1347 = vpow2.f32 %v764_v12  ;;  %v832_v12 = vmul.f32 1.442695, %v724_v62  ;;  %v838_v19 = vmul.f32 1.442695, %v727_v7  ;;  %v498_v36 = vadd.f32 %v1223_v0, %v1691_v34  ;;  %v620_v37 = vpop.f32.mrf.mxu1 }
  0xfc   : > { %v1324_v52 = vpop.eup %1323  ;;  %1033 = vst.msk [vmem:[%s1721_s27 + $0x100] sm:$0xff] %vm1000_vm1, %v1322_v47  ;;  %1349 = vpow2.f32 %v828_v21  ;;  %v770_v21 = vmul.f32 1.442695, %v693_v10  ;;  %v834_v23 = vmul.f32 1.442695, %v725_v13  ;;  %v626_v40 = vadd.f32 %v1255_v4, %v1691_v34  ;;  %v1227_v45 = vpop.f32.mrf.mxu0 }
  0xfd   : > { %v1326_v56 = vpop.eup %1325  ;;  %1004 = vst.msk [vmem:[%s1721_s27 + $0x18] sm:$0xff] %vm1000_vm1, %v1324_v52  ;;  %1351 = vpow2.f32 %v760_v39  ;;  %v1259_v49 = vpop.f32.mrf.mxu1  ;;  %v490_v55 = vadd.f32 %v1691_v34, %v489_v14  ;;  %v618_v58 = vadd.f32 %v1691_v34, %v617_v17  ;;  %v501_v63 = vadd.f32 %v1224_v24, %v1691_v34 }
  0xfe   : > { %v1328_v60 = vpop.eup %1327  ;;  %1036 = vst.msk [vmem:[%s1721_s27 + $0x118] sm:$0xff] %vm1000_vm1, %v1326_v56  ;;  %1353 = vpow2.f32 %v824_v43  ;;  %v730_v52 = vsub.f32 0.0, %v626_v40  ;;  %v505_v59 = vpop.f32.mrf.mxu0  ;;  %v629_v4 = vadd.f32 %v1256_v26, %v1691_v34  ;;  %v514_v17 = vadd.f32 %v1227_v45, %v1691_v34 }
  0xff   : > { %v1330_v1 = vpop.eup %1329  ;;  %1002 = vst.msk [vmem:[%s1721_s27 + $0x8] sm:$0xff] %vm1000_vm1, %v1328_v60  ;;  %1355 = vpow2.f32 %v766_v48  ;;  %v698_v48 = vsub.f32 0.0, %v498_v36  ;;  %v633_v0 = vpop.f32.mrf.mxu1  ;;  %v696_v7 = vsub.f32 0.0, %v490_v55  ;;  %v506_v26 = vadd.f32 %v1691_v34, %v505_v59 }
 0x100   : > { %v1332_v5 = vpop.eup %1331  ;;  %1034 = vst.msk [vmem:[%s1721_s27 + $0x108] sm:$0xff] %vm1000_vm1, %v1330_v1  ;;  %1357 = vpow2.f32 %v830_v53  ;;  %v844_v3 = vmul.f32 1.442695, %v730_v52  ;;  %v1228_v13 = vpop.f32.mrf.mxu0 }
 0x101   : > { %v1334_v8 = vpop.eup %1333  ;;  %1007 = vst.msk [vmem:[%s1721_s27 + $0x30] sm:$0xff] %vm1000_vm1, %v1332_v5  ;;  %1359 = vpow2.f32 %v762_v57  ;;  %v780_v62 = vmul.f32 1.442695, %v698_v48  ;;  %v776_v24 = vmul.f32 1.442695, %v696_v7  ;;  %v517_v36 = vadd.f32 %v1228_v13, %v1691_v34 }
 0x102   : > { %v1336_v11 = vpop.eup %1335  ;;  %1039 = vst.msk [vmem:[%s1721_s27 + $0x130] sm:$0xff] %vm1000_vm1, %v1334_v8  ;;  %1361 = vpow2.f32 %v826_v61  ;;  %v493_v8 = vadd.f32 %v1691_v34, %v492_v32 }
 0x103   : > { %v1338_v15 = vpop.eup %1337  ;;  %1005 = vst.msk [vmem:[%s1721_s27 + $0x20] sm:$0xff] %vm1000_vm1, %v1336_v11  ;;  %1363 = vpow2.f32 %v772_v2  ;;  %v728_v11 = vsub.f32 0.0, %v618_v58 }
 0x104   : > { %v1340_v18 = vpop.eup %1339  ;;  %1037 = vst.msk [vmem:[%s1721_s27 + $0x120] sm:$0xff] %vm1000_vm1, %v1338_v15  ;;  %1365 = vpow2.f32 %v836_v6 }
 0x105   : > { %v1342_v20 = vpop.eup %1341  ;;  %1008 = vst.msk [vmem:[%s1721_s27 + $0x38] sm:$0xff] %vm1000_vm1, %v1340_v18  ;;  %1367 = vpow2.f32 %v768_v9  ;;  %v1260_v18 = vpop.f32.mrf.mxu1 }
 0x106   : > { %v1344_v22 = vpop.eup %1343  ;;  %1040 = vst.msk [vmem:[%s1721_s27 + $0x138] sm:$0xff] %vm1000_vm1, %v1342_v20  ;;  %1369 = vpow2.f32 %v832_v12  ;;  %v621_v12 = vadd.f32 %v1691_v34, %v620_v37 }
 0x107   : > { %v1346_v25 = vpop.eup %1345  ;;  %1006 = vst.msk [vmem:[%s1721_s27 + $0x28] sm:$0xff] %vm1000_vm1, %v1344_v22  ;;  %1371 = vpow2.f32 %v774_v16  ;;  %v699_v16 = vsub.f32 0.0, %v501_v63  ;;  %v642_v22 = vadd.f32 %v1259_v49, %v1691_v34  ;;  %v636_v37 = vpop.f32.mrf.mxu1 }
 0x108   : > { %v1348_v27 = vpop.eup %1347  ;;  %1038 = vst.msk [vmem:[%s1721_s27 + $0x128] sm:$0xff] %vm1000_vm1, %v1346_v25  ;;  %1373 = vpow2.f32 %v838_v19  ;;  %v697_v25 = vsub.f32 0.0, %v493_v8  ;;  %v637_v49 = vadd.f32 %v1691_v34, %v636_v37 }
 0x109   : > { %v1350_v28 = vpop.eup %1349  ;;  %v882_v29 = vadd.f32 1.0, %v1348_v27  ;;  %1375 = vpow2.f32 %v770_v21  ;;  %v731_v21 = vsub.f32 0.0, %v629_v4  ;;  %v734_v40 = vsub.f32 0.0, %v642_v22 }
 0x10a   : > { %v1352_v30 = vpop.eup %1351  ;;  %v914_v31 = vadd.f32 1.0, %v1350_v28  ;;  %1377 = vpow2.f32 %v834_v23  ;;  %v840_v28 = vmul.f32 1.442695, %v728_v11  ;;  %v733_v63 = vsub.f32 0.0, %v637_v49 }
 0x10b   : > { %v1354_v33 = vpop.eup %1353  ;;  %1379 = vrcp.f32 %v882_v29  ;;  %v880_v35 = vadd.f32 1.0, %v1352_v30  ;;  %v729_v29 = vsub.f32 0.0, %v621_v12  ;;  %v634_v30 = vadd.f32 %v1691_v34, %v633_v0 }
 0x10c   : > { %v1356_v38 = vpop.eup %1355  ;;  %1381 = vrcp.f32 %v914_v31  ;;  %v912_v39 = vadd.f32 1.0, %v1354_v33  ;;  %v508_v31 = vpop.f32.mrf.mxu0  ;;  %v782_v33 = vmul.f32 1.442695, %v699_v16 }
 0x10d   : > { %v1358_v41 = vpop.eup %1357  ;;  %1383 = vrcp.f32 %v880_v35  ;;  %v883_v42 = vadd.f32 1.0, %v1356_v38  ;;  %v702_v35 = vsub.f32 0.0, %v514_v17  ;;  %v509_v45 = vadd.f32 %v1691_v34, %v508_v31 }
 0x10e   : > { %v1360_v43 = vpop.eup %1359  ;;  %1385 = vrcp.f32 %v912_v39  ;;  %v915_v44 = vadd.f32 1.0, %v1358_v41  ;;  %v846_v39 = vmul.f32 1.442695, %v731_v21  ;;  %v645_v41 = vadd.f32 %v1260_v18, %v1691_v34 }
 0x10f   : > { %v1362_v46 = vpop.eup %1361  ;;  %1387 = vrcp.f32 %v883_v42  ;;  %v881_v47 = vadd.f32 1.0, %v1360_v43  ;;  %v778_v43 = vmul.f32 1.442695, %v697_v25  ;;  %v732_v48 = vsub.f32 0.0, %v634_v30 }
 0x110   : > { %v1364_v50 = vpop.eup %1363  ;;  %1389 = vrcp.f32 %v915_v44  ;;  %v913_v51 = vadd.f32 1.0, %v1362_v46  ;;  %v700_v44 = vsub.f32 0.0, %v506_v26  ;;  %v788_v52 = vmul.f32 1.442695, %v702_v35 }
 0x111   : > { %v1366_v53 = vpop.eup %1365  ;;  %1391 = vrcp.f32 %v881_v47  ;;  %v886_v54 = vadd.f32 1.0, %v1364_v50  ;;  %v842_v47 = vmul.f32 1.442695, %v729_v29  ;;  %v1231_v50 = vpop.f32.mrf.mxu0 }
 0x112   : > { %v1368_v56 = vpop.eup %1367  ;;  %1393 = vrcp.f32 %v913_v51  ;;  %v918_v57 = vadd.f32 1.0, %v1366_v53  ;;  %v703_v53 = vsub.f32 0.0, %v517_v36  ;;  %v784_v59 = vmul.f32 1.442695, %v700_v44 }
 0x113   : > { %v1370_v60 = vpop.eup %1369  ;;  %1395 = vrcp.f32 %v886_v54  ;;  %v884_v61 = vadd.f32 1.0, %v1368_v56  ;;  %v1263_v54 = vpop.f32.mrf.mxu1  ;;  %v852_v56 = vmul.f32 1.442695, %v734_v40  ;;  %v530_v21 = vadd.f32 %v1231_v50, %v1691_v34 }
 0x114   : > { %v1372_v1 = vpop.eup %1371  ;;  %1397 = vrcp.f32 %v918_v57  ;;  %v916_v2 = vadd.f32 1.0, %v1370_v60  ;;  %v735_v57 = vsub.f32 0.0, %v645_v41  ;;  %v701_v60 = vsub.f32 0.0, %v509_v45  ;;  %v521_v0 = vpop.f32.mrf.mxu0 }
 0x115   : > { %v1374_v5 = vpop.eup %1373  ;;  %1399 = vrcp.f32 %v884_v61  ;;  %v887_v6 = vadd.f32 1.0, %v1372_v1  ;;  %v658_v25 = vadd.f32 %v1263_v54, %v1691_v34  ;;  %v522_v41 = vadd.f32 %v1691_v34, %v521_v0 }
 0x116   : > { %v1376_v9 = vpop.eup %1375  ;;  %1401 = vrcp.f32 %v916_v2  ;;  %v919_v10 = vadd.f32 1.0, %v1374_v5  ;;  %v790_v2 = vmul.f32 1.442695, %v703_v53  ;;  %v854_v5 = vmul.f32 1.442695, %v735_v57 }
 0x117   : > { %v1378_v14 = vpop.eup %1377  ;;  %1403 = vrcp.f32 %v887_v6  ;;  %v885_v15 = vadd.f32 1.0, %v1376_v9  ;;  %v786_v7 = vmul.f32 1.442695, %v701_v60  ;;  %v850_v9 = vmul.f32 1.442695, %v733_v63 }
 0x118   : > { %v1380_v19 = vpop.eup %1379  ;;  %1405 = vrcp.f32 %v919_v10  ;;  %v917_v20 = vadd.f32 1.0, %v1378_v14  ;;  %v1232_v10 = vpop.f32.mrf.mxu0  ;;  %v704_v57 = vsub.f32 0.0, %v522_v41 }
 0x119   : > { %v1382_v23 = vpop.eup %1381  ;;  %1011 = vst.msk [vmem:[%s1721_s27 + $0x50] sm:$0xff] %vm1000_vm1, %v1380_v19  ;;  %1407 = vrcp.f32 %v885_v15  ;;  %v533_v49 = vadd.f32 %v1232_v10, %v1691_v34 }
 0x11a   : > { %v1384_v27 = vpop.eup %1383  ;;  %1043 = vst.msk [vmem:[%s1721_s27 + $0x150] sm:$0xff] %vm1000_vm1, %v1382_v23  ;;  %1409 = vrcp.f32 %v917_v20  ;;  %v524_v18 = vpop.f32.mrf.mxu0  ;;  %v792_v10 = vmul.f32 1.442695, %v704_v57 }
 0x11b   : > { %v1386_v32 = vpop.eup %1385  ;;  %1009 = vst.msk [vmem:[%s1721_s27 + $0x40] sm:$0xff] %vm1000_vm1, %v1384_v27  ;;  %1411 = vpow2.f32 %v780_v62  ;;  %v848_v62 = vmul.f32 1.442695, %v732_v48 }
 0x11c   : > { %v1388_v38 = vpop.eup %1387  ;;  %1041 = vst.msk [vmem:[%s1721_s27 + $0x140] sm:$0xff] %vm1000_vm1, %v1386_v32  ;;  %1413 = vpow2.f32 %v844_v3  ;;  %v649_v3 = vpop.f32.mrf.mxu1 }
 0x11d   : > { %v1390_v42 = vpop.eup %1389  ;;  %1012 = vst.msk [vmem:[%s1721_s27 + $0x58] sm:$0xff] %vm1000_vm1, %v1388_v38  ;;  %1415 = vpow2.f32 %v776_v24  ;;  %v1235_v30 = vpop.f32.mrf.mxu0  ;;  %v738_v38 = vsub.f32 0.0, %v658_v25  ;;  %v650_v44 = vadd.f32 %v1691_v34, %v649_v3 }
 0x11e   : > { %v1392_v46 = vpop.eup %1391  ;;  %1044 = vst.msk [vmem:[%s1721_s27 + $0x158] sm:$0xff] %vm1000_vm1, %v1390_v42  ;;  %1417 = vpow2.f32 %v840_v28  ;;  %v1264_v12 = vpop.f32.mrf.mxu1  ;;  %v546_v3 = vadd.f32 %v1235_v30, %v1691_v34  ;;  %v1539_v30 = vld [vmem:[%s1898_s2] ss:$0 sm:$0xff] }
 0x11f   : > { %v1394_v51 = vpop.eup %1393  ;;  %1010 = vst.msk [vmem:[%s1721_s27 + $0x48] sm:$0xff] %vm1000_vm1, %v1392_v46  ;;  %1419 = vpow2.f32 %v782_v33  ;;  %v706_v33 = vsub.f32 0.0, %v530_v21  ;;  %v537_v45 = vpop.f32.mrf.mxu0  ;;  %v860_v53 = vmul.f32 1.442695, %v738_v38  ;;  %v661_v54 = vadd.f32 %v1264_v12, %v1691_v34 }
 0x120   : > { %v1396_v55 = vpop.eup %1395  ;;  %1042 = vst.msk [vmem:[%s1721_s27 + $0x148] sm:$0xff] %vm1000_vm1, %v1394_v51  ;;  %1421 = vpow2.f32 %v846_v39  ;;  %v652_v22 = vpop.f32.mrf.mxu1  ;;  %v538_v12 = vadd.f32 %v1691_v34, %v537_v45 }
 0x121   : > { %v1398_v58 = vpop.eup %1397  ;;  %1015 = vst.msk [vmem:[%s1721_s27 + $0x70] sm:$0xff] %vm1000_vm1, %v1396_v55  ;;  %1423 = vpow2.f32 %v778_v43  ;;  %v796_v48 = vmul.f32 1.442695, %v706_v33  ;;  %v1236_v63 = vpop.f32.mrf.mxu0 }
 0x122   : > { %v1400_v61 = vpop.eup %1399  ;;  %1047 = vst.msk [vmem:[%s1721_s27 + $0x170] sm:$0xff] %vm1000_vm1, %v1398_v58  ;;  %1425 = vpow2.f32 %v842_v47  ;;  %v1267_v35 = vpop.f32.mrf.mxu1  ;;  %v525_v58 = vadd.f32 %v1691_v34, %v524_v18  ;;  %v549_v21 = vadd.f32 %v1236_v63, %v1691_v34 }
 0x123   : > { %v1402_v1 = vpop.eup %1401  ;;  %1013 = vst.msk [vmem:[%s1721_s27 + $0x60] sm:$0xff] %vm1000_vm1, %v1400_v61  ;;  %1427 = vpow2.f32 %v788_v52  ;;  %v736_v61 = vsub.f32 0.0, %v650_v44 }
 0x124   : > { %v1404_v4 = vpop.eup %1403  ;;  %1045 = vst.msk [vmem:[%s1721_s27 + $0x160] sm:$0xff] %vm1000_vm1, %v1402_v1  ;;  %1429 = vpow2.f32 %v852_v56  ;;  %v665_v50 = vpop.f32.mrf.mxu1  ;;  %v711_v38 = vsub.f32 0.0, %v549_v21 }
 0x125   : > { %v1406_v6 = vpop.eup %1405  ;;  %1016 = vst.msk [vmem:[%s1721_s27 + $0x78] sm:$0xff] %vm1000_vm1, %v1404_v4  ;;  %1431 = vpow2.f32 %v784_v59 }
 0x126   : > { %v1408_v8 = vpop.eup %1407  ;;  %1048 = vst.msk [vmem:[%s1721_s27 + $0x178] sm:$0xff] %vm1000_vm1, %v1406_v6  ;;  %1433 = vpow2.f32 %v848_v62  ;;  %v653_v62 = vadd.f32 %v1691_v34, %v652_v22  ;;  %v1268_v4 = vpop.f32.mrf.mxu1 }
 0x127   : > { %v1410_v11 = vpop.eup %1409  ;;  %1014 = vst.msk [vmem:[%s1721_s27 + $0x68] sm:$0xff] %vm1000_vm1, %v1408_v8  ;;  %1435 = vpow2.f32 %v790_v2  ;;  %v707_v2 = vsub.f32 0.0, %v533_v49  ;;  %v674_v8 = vadd.f32 %v1267_v35, %v1691_v34  ;;  %v806_v49 = vmul.f32 1.442695, %v711_v38 }
 0x128   : > { %v1412_v13 = vpop.eup %1411  ;;  %1046 = vst.msk [vmem:[%s1721_s27 + $0x168] sm:$0xff] %vm1000_vm1, %v1410_v11  ;;  %1437 = vpow2.f32 %v854_v5  ;;  %v705_v11 = vsub.f32 0.0, %v525_v58  ;;  %v668_v22 = vpop.f32.mrf.mxu1 }
 0x129   : > { %v1414_v14 = vpop.eup %1413  ;;  %v890_v15 = vadd.f32 1.0, %v1412_v13  ;;  %1439 = vpow2.f32 %v786_v7  ;;  %v739_v7 = vsub.f32 0.0, %v661_v54  ;;  %v742_v25 = vsub.f32 0.0, %v674_v8 }
 0x12a   : > { %v1416_v16 = vpop.eup %1415  ;;  %v922_v17 = vadd.f32 1.0, %v1414_v14  ;;  %1441 = vpow2.f32 %v850_v9  ;;  %v856_v14 = vmul.f32 1.442695, %v736_v61 }
 0x12b   : > { %v1418_v19 = vpop.eup %1417  ;;  %1443 = vrcp.f32 %v890_v15  ;;  %v888_v20 = vadd.f32 1.0, %v1416_v16  ;;  %v737_v15 = vsub.f32 0.0, %v653_v62  ;;  %v666_v16 = vadd.f32 %v1691_v34, %v665_v50 }
 0x12c   : > { %v1420_v23 = vpop.eup %1419  ;;  %1445 = vrcp.f32 %v922_v17  ;;  %v920_v24 = vadd.f32 1.0, %v1418_v19  ;;  %v540_v17 = vpop.f32.mrf.mxu0  ;;  %v798_v19 = vmul.f32 1.442695, %v707_v2 }
 0x12d   : > { %v1422_v26 = vpop.eup %1421  ;;  %1447 = vrcp.f32 %v888_v20  ;;  %v891_v27 = vadd.f32 1.0, %v1420_v23  ;;  %v710_v20 = vsub.f32 0.0, %v546_v3  ;;  %v858_v33 = vmul.f32 1.442695, %v737_v15 }
 0x12e   : > { %v1424_v28 = vpop.eup %1423  ;;  %1449 = vrcp.f32 %v920_v24  ;;  %v923_v29 = vadd.f32 1.0, %v1422_v26  ;;  %v862_v24 = vmul.f32 1.442695, %v739_v7  ;;  %v677_v26 = vadd.f32 %v1268_v4, %v1691_v34 }
 0x12f   : > { %v1426_v31 = vpop.eup %1425  ;;  %1451 = vrcp.f32 %v891_v27  ;;  %v889_v32 = vadd.f32 1.0, %v1424_v28  ;;  %v794_v28 = vmul.f32 1.442695, %v705_v11  ;;  %v740_v35 = vsub.f32 0.0, %v666_v16 }
 0x130   : > { %v1428_v36 = vpop.eup %1427  ;;  %1453 = vrcp.f32 %v923_v29  ;;  %v921_v37 = vadd.f32 1.0, %v1426_v31  ;;  %v708_v29 = vsub.f32 0.0, %v538_v12  ;;  %v541_v31 = vadd.f32 %v1539_v30, %v540_v17 }
 0x131   : > { %v1430_v39 = vpop.eup %1429  ;;  %1455 = vrcp.f32 %v889_v32  ;;  %v894_v40 = vadd.f32 1.0, %v1428_v36  ;;  %v669_v34 = vadd.f32 %v1539_v30, %v668_v22  ;;  %v743_v41 = vsub.f32 0.0, %v677_v26 }
 0x132   : > { %v1432_v42 = vpop.eup %1431  ;;  %1457 = vrcp.f32 %v921_v37  ;;  %v926_v43 = vadd.f32 1.0, %v1430_v39  ;;  %v804_v37 = vmul.f32 1.442695, %v710_v20  ;;  %v709_v44 = vsub.f32 0.0, %v541_v31 }
 0x133   : > { %v1434_v46 = vpop.eup %1433  ;;  %1459 = vrcp.f32 %v894_v40  ;;  %v892_v47 = vadd.f32 1.0, %v1432_v42  ;;  %v868_v40 = vmul.f32 1.442695, %v742_v25 }
 0x134   : > { %v1436_v51 = vpop.eup %1435  ;;  %1461 = vrcp.f32 %v926_v43  ;;  %v924_v52 = vadd.f32 1.0, %v1434_v46  ;;  %v800_v43 = vmul.f32 1.442695, %v708_v29  ;;  %v864_v46 = vmul.f32 1.442695, %v740_v35 }
 0x135   : > { %v1438_v55 = vpop.eup %1437  ;;  %1463 = vrcp.f32 %v892_v47  ;;  %v895_v56 = vadd.f32 1.0, %v1436_v51  ;;  %v741_v47 = vsub.f32 0.0, %v669_v34  ;;  %v870_v51 = vmul.f32 1.442695, %v743_v41 }
 0x136   : > { %v1440_v59 = vpop.eup %1439  ;;  %1465 = vrcp.f32 %v924_v52  ;;  %v927_v60 = vadd.f32 1.0, %v1438_v55 }
 0x137   : > { %v1442_v0 = vpop.eup %1441  ;;  %1467 = vrcp.f32 %v895_v56  ;;  %v893_v1 = vadd.f32 1.0, %v1440_v59  ;;  %v866_v55 = vmul.f32 1.442695, %v741_v47 }
 0x138   : > { %v1444_v5 = vpop.eup %1443  ;;  %1469 = vrcp.f32 %v927_v60  ;;  %v925_v6 = vadd.f32 1.0, %v1442_v0 }
 0x139   : > { %v1446_v9 = vpop.eup %1445  ;;  %1019 = vst.msk [vmem:[%s1721_s27 + $0x90] sm:$0xff] %vm1000_vm1, %v1444_v5  ;;  %1471 = vrcp.f32 %v893_v1 }
 0x13a   : > { %v1448_v13 = vpop.eup %1447  ;;  %1051 = vst.msk [vmem:[%s1721_s27 + $0x190] sm:$0xff] %vm1000_vm1, %v1446_v9  ;;  %1473 = vrcp.f32 %v925_v6 }
 0x13b   : > { %v1450_v18 = vpop.eup %1449  ;;  %1017 = vst.msk [vmem:[%s1721_s27 + $0x80] sm:$0xff] %vm1000_vm1, %v1448_v13  ;;  %1475 = vpow2.f32 %v796_v48 }
 0x13c   : > { %v1452_v23 = vpop.eup %1451  ;;  %1049 = vst.msk [vmem:[%s1721_s27 + $0x180] sm:$0xff] %vm1000_vm1, %v1450_v18  ;;  %1477 = vpow2.f32 %v860_v53  ;;  %v802_v53 = vmul.f32 1.442695, %v709_v44 }
 0x13d   : > { %v1454_v27 = vpop.eup %1453  ;;  %1020 = vst.msk [vmem:[%s1721_s27 + $0x98] sm:$0xff] %vm1000_vm1, %v1452_v23  ;;  %1479 = vpow2.f32 %v792_v10 }
 0x13e   : > { %v1456_v32 = vpop.eup %1455  ;;  %1052 = vst.msk [vmem:[%s1721_s27 + $0x198] sm:$0xff] %vm1000_vm1, %v1454_v27  ;;  %1481 = vpow2.f32 %v856_v14 }
 0x13f   : > { %v1458_v36 = vpop.eup %1457  ;;  %1018 = vst.msk [vmem:[%s1721_s27 + $0x88] sm:$0xff] %vm1000_vm1, %v1456_v32  ;;  %1483 = vpow2.f32 %v798_v19 }
 0x140   : > { %v1460_v39 = vpop.eup %1459  ;;  %1050 = vst.msk [vmem:[%s1721_s27 + $0x188] sm:$0xff] %vm1000_vm1, %v1458_v36  ;;  %1485 = vpow2.f32 %v862_v24 }
 0x141   : > { %v1462_v42 = vpop.eup %1461  ;;  %1023 = vst.msk [vmem:[%s1721_s27 + $0xb0] sm:$0xff] %vm1000_vm1, %v1460_v39  ;;  %1487 = vpow2.f32 %v794_v28 }
 0x142   : > { %v1464_v45 = vpop.eup %1463  ;;  %1055 = vst.msk [vmem:[%s1721_s27 + $0x1b0] sm:$0xff] %vm1000_vm1, %v1462_v42  ;;  %1489 = vpow2.f32 %v858_v33 }
 0x143   : > { %v1466_v48 = vpop.eup %1465  ;;  %1021 = vst.msk [vmem:[%s1721_s27 + $0xa0] sm:$0xff] %vm1000_vm1, %v1464_v45  ;;  %1491 = vpow2.f32 %v804_v37 }
 0x144   : > { %v1468_v50 = vpop.eup %1467  ;;  %1053 = vst.msk [vmem:[%s1721_s27 + $0x1a0] sm:$0xff] %vm1000_vm1, %v1466_v48  ;;  %1493 = vpow2.f32 %v868_v40 }
 0x145   : > { %v1470_v52 = vpop.eup %1469  ;;  %1024 = vst.msk [vmem:[%s1721_s27 + $0xb8] sm:$0xff] %vm1000_vm1, %v1468_v50  ;;  %1495 = vpow2.f32 %v800_v43 }
 0x146   : > { %v1472_v54 = vpop.eup %1471  ;;  %1056 = vst.msk [vmem:[%s1721_s27 + $0x1b8] sm:$0xff] %vm1000_vm1, %v1470_v52  ;;  %1497 = vpow2.f32 %v864_v46 }
 0x147   : > { %v1474_v56 = vpop.eup %1473  ;;  %1022 = vst.msk [vmem:[%s1721_s27 + $0xa8] sm:$0xff] %vm1000_vm1, %v1472_v54  ;;  %1499 = vpow2.f32 %v806_v49 }
 0x148   : > { %v1476_v57 = vpop.eup %1475  ;;  %1054 = vst.msk [vmem:[%s1721_s27 + $0x1a8] sm:$0xff] %vm1000_vm1, %v1474_v56  ;;  %1501 = vpow2.f32 %v870_v51 }
 0x149   : > { %v1478_v58 = vpop.eup %1477  ;;  %v898_v59 = vadd.f32 1.0, %v1476_v57  ;;  %1503 = vpow2.f32 %v802_v53 }
 0x14a   : > { %v1480_v60 = vpop.eup %1479  ;;  %v930_v61 = vadd.f32 1.0, %v1478_v58  ;;  %1505 = vpow2.f32 %v866_v55 }
 0x14b   : > { %v1482_v62 = vpop.eup %1481  ;;  %1507 = vrcp.f32 %v898_v59  ;;  %v896_v63 = vadd.f32 1.0, %v1480_v60 }
 0x14c   : > { %v1484_v0 = vpop.eup %1483  ;;  %1509 = vrcp.f32 %v930_v61  ;;  %v928_v1 = vadd.f32 1.0, %v1482_v62 }
 0x14d   : > { %v1486_v2 = vpop.eup %1485  ;;  %1511 = vrcp.f32 %v896_v63  ;;  %v899_v3 = vadd.f32 1.0, %v1484_v0 }
 0x14e   : > { %v1488_v4 = vpop.eup %1487  ;;  %1513 = vrcp.f32 %v928_v1  ;;  %v931_v5 = vadd.f32 1.0, %v1486_v2 }
 0x14f   : > { %v1490_v6 = vpop.eup %1489  ;;  %1515 = vrcp.f32 %v899_v3  ;;  %v897_v7 = vadd.f32 1.0, %v1488_v4 }
 0x150   : > { %v1492_v8 = vpop.eup %1491  ;;  %1517 = vrcp.f32 %v931_v5  ;;  %v929_v9 = vadd.f32 1.0, %v1490_v6 }
 0x151   : > { %v1494_v10 = vpop.eup %1493  ;;  %1519 = vrcp.f32 %v897_v7  ;;  %v902_v11 = vadd.f32 1.0, %v1492_v8 }
 0x152   : > { %v1496_v12 = vpop.eup %1495  ;;  %1521 = vrcp.f32 %v929_v9  ;;  %v934_v13 = vadd.f32 1.0, %v1494_v10 }
 0x153   : > { %v1498_v14 = vpop.eup %1497  ;;  %1523 = vrcp.f32 %v902_v11  ;;  %v900_v15 = vadd.f32 1.0, %v1496_v12 }
 0x154   : > { %v1500_v16 = vpop.eup %1499  ;;  %1525 = vrcp.f32 %v934_v13  ;;  %v932_v17 = vadd.f32 1.0, %v1498_v14 }
 0x155   : > { %v1502_v18 = vpop.eup %1501  ;;  %1527 = vrcp.f32 %v900_v15  ;;  %v903_v19 = vadd.f32 1.0, %v1500_v16 }
 0x156   : > { %v1504_v20 = vpop.eup %1503  ;;  %1529 = vrcp.f32 %v932_v17  ;;  %v935_v21 = vadd.f32 1.0, %v1502_v18 }
 0x157   : > { %v1506_v22 = vpop.eup %1505  ;;  %1531 = vrcp.f32 %v903_v19  ;;  %v901_v23 = vadd.f32 1.0, %v1504_v20 }
 0x158   : > { %v1508_v24 = vpop.eup %1507  ;;  %1533 = vrcp.f32 %v935_v21  ;;  %v933_v25 = vadd.f32 1.0, %v1506_v22 }
 0x159   : > { %v1510_v26 = vpop.eup %1509  ;;  %1027 = vst.msk [vmem:[%s1721_s27 + $0xd0] sm:$0xff] %vm1000_vm1, %v1508_v24  ;;  %1535 = vrcp.f32 %v901_v23 }
 0x15a   : > { %v1512_v27 = vpop.eup %1511  ;;  %1059 = vst.msk [vmem:[%s1721_s27 + $0x1d0] sm:$0xff] %vm1000_vm1, %v1510_v26  ;;  %1537 = vrcp.f32 %v933_v25 }
 0x15b   : > { %v1514_v28 = vpop.eup %1513  ;;  %1025 = vst.msk [vmem:[%s1721_s27 + $0xc0] sm:$0xff] %vm1000_vm1, %v1512_v27 }
 0x15c   : > { %v1516_v29 = vpop.eup %1515  ;;  %1057 = vst.msk [vmem:[%s1721_s27 + $0x1c0] sm:$0xff] %vm1000_vm1, %v1514_v28 }
 0x15d   : > { %v1518_v30 = vpop.eup %1517  ;;  %1028 = vst.msk [vmem:[%s1721_s27 + $0xd8] sm:$0xff] %vm1000_vm1, %v1516_v29 }
 0x15e   : > { %v1520_v31 = vpop.eup %1519  ;;  %1060 = vst.msk [vmem:[%s1721_s27 + $0x1d8] sm:$0xff] %vm1000_vm1, %v1518_v30 }
 0x15f   : > { %v1522_v32 = vpop.eup %1521  ;;  %1026 = vst.msk [vmem:[%s1721_s27 + $0xc8] sm:$0xff] %vm1000_vm1, %v1520_v31 }
 0x160   : > { %v1524_v33 = vpop.eup %1523  ;;  %1058 = vst.msk [vmem:[%s1721_s27 + $0x1c8] sm:$0xff] %vm1000_vm1, %v1522_v32 }
 0x161   : > { %v1526_v35 = vpop.eup %1525  ;;  %1031 = vst.msk [vmem:[%s1721_s27 + $0xf0] sm:$0xff] %vm1000_vm1, %v1524_v33 }
 0x162   : > { %v1528_v34 = vpop.eup %1527  ;;  %1063 = vst.msk [vmem:[%s1721_s27 + $0x1f0] sm:$0xff] %vm1000_vm1, %v1526_v35 }
 0x163   : > { %v1530_v36 = vpop.eup %1529  ;;  %1029 = vst.msk [vmem:[%s1721_s27 + $0xe0] sm:$0xff] %vm1000_vm1, %v1528_v34 }
 0x164   : > { %v1532_v37 = vpop.eup %1531  ;;  %1061 = vst.msk [vmem:[%s1721_s27 + $0x1e0] sm:$0xff] %vm1000_vm1, %v1530_v36 }
 0x165   : > { %v1534_v38 = vpop.eup %1533  ;;  %1032 = vst.msk [vmem:[%s1721_s27 + $0xf8] sm:$0xff] %vm1000_vm1, %v1532_v37 }
 0x166   : > { %v1536_v39 = vpop.eup %1535  ;;  %1064 = vst.msk [vmem:[%s1721_s27 + $0x1f8] sm:$0xff] %vm1000_vm1, %v1534_v38 }
 0x167   : > { %v1538_v40 = vpop.eup %1537  ;;  %1030 = vst.msk [vmem:[%s1721_s27 + $0xe8] sm:$0xff] %vm1000_vm1, %v1536_v39 }
 0x168   : > { %1062 = vst.msk [vmem:[%s1721_s27 + $0x1e8] sm:$0xff] %vm1000_vm1, %v1538_v40 }
 0x169 PF: > { %s13_s12 = sadd.s32 1, %s1546_s12  }
 0x16a   : > { %p10_p4 = scmp.ge.s32.totalorder %s13_s12, 4  }
 0x16c   :  { %12 = sbr.rel (!%p10_p4) target bundleno = 1 (0x1), region = 62 }

</bundles_post_ra>
